<compile_context>
chip_gen: v5e
topology: v5e:2x2
jax: 0.10.0
libtpu: 0.0.40
codegen_flags: <defaults>
</compile_context>

<pallas_src>
import functools

import jax
import jax.numpy as jnp
from jax.experimental import pallas as pl
from jax.experimental.pallas import tpu as pltpu

KS = 3  # conv kernel size (3x3, padding=1, stride=1)


def _conv_relu_kernel(x_ref, w_ref, b_ref, o_ref, *, H, W):
    # x_ref: (1, Cin, H*W)     one batch element, NCHW with spatial on lanes
    # w_ref: (Cout, K*K*Cin)   weights, contraction order (kh, kw, cin)
    # b_ref: (Cout, 1)         bias
    # o_ref: (1, Cout, H*W)    lane-dense output tile
    x = x_ref[0]                                 # (Cin, HW)
    Cin, HW = x.shape

    # Column index of each flattened spatial position (lane), for masking the
    # horizontal halo.  Vertical halo is handled by zero-fill in the shift.
    col = jax.lax.broadcasted_iota(jnp.int32, (1, HW), 1) % W
    mask_l = col >= 1            # valid when reading the left  neighbour (dw=-1)
    mask_r = col < (W - 1)       # valid when reading the right neighbour (dw=+1)

    def shift(v, s):
        # y[:, p] = v[:, p + s], zero-filled where p + s is outside [0, HW).
        if s == 0:
            return v
        if s > 0:
            return jnp.concatenate(
                [v[:, s:], jnp.zeros((Cin, s), v.dtype)], axis=1)
        return jnp.concatenate(
            [jnp.zeros((Cin, -s), v.dtype), v[:, :HW + s]], axis=1)

    # im2col: 9 shifted+masked copies of x, stacked along the contraction axis.
    taps = []
    for kh in range(KS):
        for kw in range(KS):
            dh, dw = kh - KS // 2, kw - KS // 2
            t = shift(x, dh * W + dw)
            if dw < 0:
                t = jnp.where(mask_l, t, 0.0)
            elif dw > 0:
                t = jnp.where(mask_r, t, 0.0)
            taps.append(t)
    cols = jnp.concatenate(taps, axis=0)         # (K*K*Cin, HW) = (36, 256)

    # One MXU matmul with the full contraction depth (K*K*Cin = 36).
    # Operands kept f32 to preserve the 1e-4 parity check with the reference;
    # for a large backbone, cast operands to bf16 (f32 accumulate) here.
    acc = jnp.dot(w_ref[...], cols,
                  preferred_element_type=jnp.float32)  # (Cout, HW) = (8, 256)
    o_ref[0] = jnp.maximum(acc + b_ref[...], 0.0).astype(o_ref.dtype)


def overlap_model_forward(img_nchw, weight_hwio, bias):
    """Forward pass of OverlapModel(conv3x3 + ReLU).

    img_nchw:    (B, C_in, H, W)  float32, PyTorch NCHW convention
    weight_hwio: (K, K, C_in, C_out)
    bias:        (C_out,)
    returns:     (B, C_out, H, W) float32 (NCHW, matching PyTorch)
    """
    B, Cin, H, W = img_nchw.shape
    Cout = weight_hwio.shape[-1]
    HW = H * W

    # Activation glue is reshape-only (free): no transpose, no pad.
    x = img_nchw.reshape(B, Cin, HW)
    # Parameter repacking (tiny, one-time): (K,K,Cin,Cout) -> (Cout, K*K*Cin)
    # with contraction order (kh, kw, cin), matching the kernel's im2col order.
    w2 = jnp.transpose(weight_hwio, (3, 0, 1, 2)).reshape(Cout, KS * KS * Cin)
    b2 = bias.reshape(Cout, 1)

    kernel = functools.partial(_conv_relu_kernel, H=H, W=W)

    out_flat = pl.pallas_call(
        kernel,
        out_shape=jax.ShapeDtypeStruct((B, Cout, HW), jnp.float32),
        grid_spec=pltpu.PrefetchScalarGridSpec(
            num_scalar_prefetch=0,
            grid=(B,),
            in_specs=[
                pl.BlockSpec((1, Cin, HW), lambda b: (b, 0, 0)),
                pl.BlockSpec((Cout, KS * KS * Cin), lambda b: (0, 0)),
                pl.BlockSpec((Cout, 1), lambda b: (0, 0)),
            ],
            out_specs=pl.BlockSpec((1, Cout, HW), lambda b: (b, 0, 0)),
        ),
        compiler_params=pltpu.CompilerParams(
            dimension_semantics=("parallel",)),
    )(x, w2, b2)

    # (B, Cout, H*W) -> (B, Cout, H, W): a free reshape, already NCHW.
    return out_flat.reshape(B, Cout, H, W)


def _reference_forward(img_nchw, weight_hwio, bias):
    # Pure-JAX reference (lax conv) for a correctness check.
    out = jax.lax.conv_general_dilated(
        img_nchw, weight_hwio,
        window_strides=(1, 1), padding="SAME",
        dimension_numbers=("NCHW", "HWIO", "NCHW"))
    out = out + bias.reshape(1, -1, 1, 1)
    return jnp.maximum(out, 0.0)


if __name__ == "__main__":
    key = jax.random.PRNGKey(0)
    k_img, k_w, k_b = jax.random.split(key, 3)

    B, Cin, H, W = 2, 4, 16, 16
    Cout = 8

    img = jax.random.normal(k_img, (B, Cin, H, W), dtype=jnp.float32)
    # Deterministic Kaiming-ish init for the synthetic inner model.
    fan_in = Cin * KS * KS
    weight = jax.random.normal(k_w, (KS, KS, Cin, Cout), dtype=jnp.float32)
    weight = weight * (2.0 / fan_in) ** 0.5
    bias = jax.random.normal(k_b, (Cout,), dtype=jnp.float32) * 0.01

    out = overlap_model_forward(img, weight, bias)
    out = jax.block_until_ready(out)

    ref = jax.block_until_ready(_reference_forward(img, weight, bias))
    assert out.shape == (B, Cout, H, W)
    assert jnp.allclose(out, ref, atol=1e-4, rtol=1e-4)

    print("KERNEL_OK")
</pallas_src>

<mosaic_0001>
module attributes {stable_mosaic.version = 11 : i64} {
  func.func @_conv_relu_kernel(%arg0: i32, %arg1: memref<1x4x256xf32, #tpu.memory_space<vmem>>, %arg2: memref<8x36xf32, #tpu.memory_space<vmem>>, %arg3: memref<8x1xf32, #tpu.memory_space<vmem>>, %arg4: memref<1x8x256xf32, #tpu.memory_space<vmem>>) attributes {dimension_semantics = [#tpu.dimension_semantics<parallel>], iteration_bounds = array<i64: 2>, scalar_prefetch = 0 : i64, scratch_operands = 0 : i64, tpu.core_type = #tpu.core_type<tc>, window_params = [{transform_indices = @transform_0, window_bounds = array<i64: 1, 4, 256>}, {pipeline_mode = #tpu.pipeline_mode<synchronous>, transform_indices = @transform_1, window_bounds = array<i64: 8, 36>}, {pipeline_mode = #tpu.pipeline_mode<synchronous>, transform_indices = @transform_2, window_bounds = array<i64: 8, 1>}, {transform_indices = @transform_3, window_bounds = array<i64: 1, 8, 256>}]} {
    %c0 = arith.constant 0 : index
    %c0_0 = arith.constant 0 : index
    %c0_1 = arith.constant 0 : index
    %0 = vector.load %arg1[%c0, %c0_0, %c0_1] : memref<1x4x256xf32, #tpu.memory_space<vmem>>, vector<1x4x256xf32>
    %1 = vector.shape_cast %0 : vector<1x4x256xf32> to vector<4x256xf32>
    %2 = tpu.iota {dimensions = array<i32: 1>} : vector<1x256xi32>
    %c16_i32 = arith.constant 16 : i32
    %c0_i32 = arith.constant 0 : i32
    %3 = arith.cmpi eq, %c16_i32, %c0_i32 : i32
    %c1_i32 = arith.constant 1 : i32
    %4 = arith.select %3, %c1_i32, %c16_i32 : i32
    %5 = vector.broadcast %4 : i32 to vector<1x256xi32>
    %6 = arith.remsi %2, %5 : vector<1x256xi32>
    %c0_i32_2 = arith.constant 0 : i32
    %7 = vector.broadcast %c0_i32_2 : i32 to vector<1x256xi32>
    %8 = arith.cmpi ne, %6, %7 : vector<1x256xi32>
    %c0_i32_3 = arith.constant 0 : i32
    %9 = vector.broadcast %c0_i32_3 : i32 to vector<1x256xi32>
    %10 = arith.cmpi slt, %6, %9 : vector<1x256xi32>
    %c0_i32_4 = arith.constant 0 : i32
    %11 = arith.cmpi slt, %4, %c0_i32_4 : i32
    %12 = vector.broadcast %11 : i1 to vector<1x256xi1>
    %13 = vector.broadcast %12 : vector<1x256xi1> to vector<1x256xi1>
    %14 = arith.xori %10, %13 : vector<1x256xi1>
    %15 = arith.andi %14, %8 : vector<1x256xi1>
    %16 = vector.broadcast %4 : i32 to vector<1x256xi32>
    %17 = arith.addi %6, %16 : vector<1x256xi32>
    %18 = arith.select %15, %17, %6 : vector<1x256xi1>, vector<1x256xi32>
    %c1_i32_5 = arith.constant 1 : i32
    %19 = vector.broadcast %c1_i32_5 : i32 to vector<1x256xi32>
    %20 = arith.cmpi sge, %18, %19 : vector<1x256xi32>
    %c15_i32 = arith.constant 15 : i32
    %21 = vector.broadcast %c15_i32 : i32 to vector<1x256xi32>
    %22 = arith.cmpi slt, %18, %21 : vector<1x256xi32>
    %cst = arith.constant 0.000000e+00 : f32
    %23 = vector.broadcast %cst : f32 to vector<4x17xf32>
    %24 = vector.extract_strided_slice %1 {offsets = [0, 0], sizes = [4, 239], strides = [1, 1]} : vector<4x256xf32> to vector<4x239xf32>
    %25 = tpu.concatenate %23, %24 in 1 : vector<4x17xf32>, vector<4x239xf32> -> vector<4x256xf32>
    %cst_6 = arith.constant 0.000000e+00 : f32
    %26 = vector.shape_cast %20 : vector<1x256xi1> to vector<1x256xi1>
    %27 = vector.broadcast %26 : vector<1x256xi1> to vector<4x256xi1>
    %28 = vector.broadcast %cst_6 : f32 to vector<4x256xf32>
    %29 = arith.select %27, %25, %28 : vector<4x256xi1>, vector<4x256xf32>
    %cst_7 = arith.constant 0.000000e+00 : f32
    %30 = vector.broadcast %cst_7 : f32 to vector<4x16xf32>
    %31 = vector.extract_strided_slice %1 {offsets = [0, 0], sizes = [4, 240], strides = [1, 1]} : vector<4x256xf32> to vector<4x240xf32>
    %32 = tpu.concatenate %30, %31 in 1 : vector<4x16xf32>, vector<4x240xf32> -> vector<4x256xf32>
    %cst_8 = arith.constant 0.000000e+00 : f32
    %33 = vector.broadcast %cst_8 : f32 to vector<4x15xf32>
    %34 = vector.extract_strided_slice %1 {offsets = [0, 0], sizes = [4, 241], strides = [1, 1]} : vector<4x256xf32> to vector<4x241xf32>
    %35 = tpu.concatenate %33, %34 in 1 : vector<4x15xf32>, vector<4x241xf32> -> vector<4x256xf32>
    %cst_9 = arith.constant 0.000000e+00 : f32
    %36 = vector.shape_cast %22 : vector<1x256xi1> to vector<1x256xi1>
    %37 = vector.broadcast %36 : vector<1x256xi1> to vector<4x256xi1>
    %38 = vector.broadcast %cst_9 : f32 to vector<4x256xf32>
    %39 = arith.select %37, %35, %38 : vector<4x256xi1>, vector<4x256xf32>
    %cst_10 = arith.constant 0.000000e+00 : f32
    %40 = vector.broadcast %cst_10 : f32 to vector<4x1xf32>
    %41 = vector.extract_strided_slice %1 {offsets = [0, 0], sizes = [4, 255], strides = [1, 1]} : vector<4x256xf32> to vector<4x255xf32>
    %42 = tpu.concatenate %40, %41 in 1 : vector<4x1xf32>, vector<4x255xf32> -> vector<4x256xf32>
    %cst_11 = arith.constant 0.000000e+00 : f32
    %43 = vector.shape_cast %20 : vector<1x256xi1> to vector<1x256xi1>
    %44 = vector.broadcast %43 : vector<1x256xi1> to vector<4x256xi1>
    %45 = vector.broadcast %cst_11 : f32 to vector<4x256xf32>
    %46 = arith.select %44, %42, %45 : vector<4x256xi1>, vector<4x256xf32>
    %47 = vector.extract_strided_slice %1 {offsets = [0, 1], sizes = [4, 255], strides = [1, 1]} : vector<4x256xf32> to vector<4x255xf32>
    %cst_12 = arith.constant 0.000000e+00 : f32
    %48 = vector.broadcast %cst_12 : f32 to vector<4x1xf32>
    %49 = tpu.concatenate %47, %48 in 1 : vector<4x255xf32>, vector<4x1xf32> -> vector<4x256xf32>
    %cst_13 = arith.constant 0.000000e+00 : f32
    %50 = vector.shape_cast %22 : vector<1x256xi1> to vector<1x256xi1>
    %51 = vector.broadcast %50 : vector<1x256xi1> to vector<4x256xi1>
    %52 = vector.broadcast %cst_13 : f32 to vector<4x256xf32>
    %53 = arith.select %51, %49, %52 : vector<4x256xi1>, vector<4x256xf32>
    %54 = vector.extract_strided_slice %1 {offsets = [0, 15], sizes = [4, 241], strides = [1, 1]} : vector<4x256xf32> to vector<4x241xf32>
    %cst_14 = arith.constant 0.000000e+00 : f32
    %55 = vector.broadcast %cst_14 : f32 to vector<4x15xf32>
    %56 = tpu.concatenate %54, %55 in 1 : vector<4x241xf32>, vector<4x15xf32> -> vector<4x256xf32>
    %cst_15 = arith.constant 0.000000e+00 : f32
    %57 = vector.shape_cast %20 : vector<1x256xi1> to vector<1x256xi1>
    %58 = vector.broadcast %57 : vector<1x256xi1> to vector<4x256xi1>
    %59 = vector.broadcast %cst_15 : f32 to vector<4x256xf32>
    %60 = arith.select %58, %56, %59 : vector<4x256xi1>, vector<4x256xf32>
    %61 = vector.extract_strided_slice %1 {offsets = [0, 16], sizes = [4, 240], strides = [1, 1]} : vector<4x256xf32> to vector<4x240xf32>
    %cst_16 = arith.constant 0.000000e+00 : f32
    %62 = vector.broadcast %cst_16 : f32 to vector<4x16xf32>
    %63 = tpu.concatenate %61, %62 in 1 : vector<4x240xf32>, vector<4x16xf32> -> vector<4x256xf32>
    %64 = vector.extract_strided_slice %1 {offsets = [0, 17], sizes = [4, 239], strides = [1, 1]} : vector<4x256xf32> to vector<4x239xf32>
    %cst_17 = arith.constant 0.000000e+00 : f32
    %65 = vector.broadcast %cst_17 : f32 to vector<4x17xf32>
    %66 = tpu.concatenate %64, %65 in 1 : vector<4x239xf32>, vector<4x17xf32> -> vector<4x256xf32>
    %cst_18 = arith.constant 0.000000e+00 : f32
    %67 = vector.shape_cast %22 : vector<1x256xi1> to vector<1x256xi1>
    %68 = vector.broadcast %67 : vector<1x256xi1> to vector<4x256xi1>
    %69 = vector.broadcast %cst_18 : f32 to vector<4x256xf32>
    %70 = arith.select %68, %66, %69 : vector<4x256xi1>, vector<4x256xf32>
    %71 = tpu.concatenate %29, %32, %39, %46, %1, %53, %60, %63, %70 in 0 : vector<4x256xf32>, vector<4x256xf32>, vector<4x256xf32>, vector<4x256xf32>, vector<4x256xf32>, vector<4x256xf32>, vector<4x256xf32>, vector<4x256xf32>, vector<4x256xf32> -> vector<36x256xf32>
    %c0_19 = arith.constant 0 : index
    %c0_20 = arith.constant 0 : index
    %72 = vector.load %arg2[%c0_19, %c0_20] : memref<8x36xf32, #tpu.memory_space<vmem>>, vector<8x36xf32>
    %cst_21 = arith.constant dense<0.000000e+00> : vector<8x256xf32>
    %73 = tpu.matmul %72, %71, %cst_21 {dimension_numbers = #tpu.dot_dimension_numbers<[1], [0], [0], [1], [0, 0, 1, 1], [], []>} : vector<8x36xf32>, vector<36x256xf32>, vector<8x256xf32> -> vector<8x256xf32>
    %c0_22 = arith.constant 0 : index
    %c0_23 = arith.constant 0 : index
    %74 = vector.load %arg3[%c0_22, %c0_23] : memref<8x1xf32, #tpu.memory_space<vmem>>, vector<8x1xf32>
    %75 = vector.broadcast %74 : vector<8x1xf32> to vector<8x256xf32>
    %76 = arith.addf %73, %75 : vector<8x256xf32>
    %cst_24 = arith.constant 0.000000e+00 : f32
    %77 = vector.broadcast %cst_24 : f32 to vector<8x256xf32>
    %78 = arith.maximumf %76, %77 : vector<8x256xf32>
    %c0_25 = arith.constant 0 : index
    %c0_26 = arith.constant 0 : index
    %c0_27 = arith.constant 0 : index
    %79 = vector.load %arg4[%c0_25, %c0_26, %c0_27] : memref<1x8x256xf32, #tpu.memory_space<vmem>>, vector<1x8x256xf32>
    %80 = vector.shape_cast %79 : vector<1x8x256xf32> to vector<8x256xf32>
    %81 = vector.shape_cast %78 : vector<8x256xf32> to vector<1x8x256xf32>
    tpu.vector_store %arg4[%c0_25, %c0_26, %c0_27], %81 {strides = array<i32>} : memref<1x8x256xf32, #tpu.memory_space<vmem>>, vector<1x8x256xf32>,
    return
  }
  func.func @transform_0(%arg0: i32) -> (i32, i32, i32) {
    %c0_i32 = arith.constant 0 : i32
    %c0_i32_0 = arith.constant 0 : i32
    %c0_i32_1 = arith.constant 0 : i32
    return %arg0, %c0_i32, %c0_i32_0 : i32, i32, i32
  }
  func.func @transform_1(%arg0: i32) -> (i32, i32) {
    %c0_i32 = arith.constant 0 : i32
    %c0_i32_0 = arith.constant 0 : i32
    %c0_i32_1 = arith.constant 0 : i32
    return %c0_i32, %c0_i32_0 : i32, i32
  }
  func.func @transform_2(%arg0: i32) -> (i32, i32) {
    %c0_i32 = arith.constant 0 : i32
    %c0_i32_0 = arith.constant 0 : i32
    %c0_i32_1 = arith.constant 0 : i32
    return %c0_i32, %c0_i32_0 : i32, i32
  }
  func.func @transform_3(%arg0: i32) -> (i32, i32, i32) {
    %c0_i32 = arith.constant 0 : i32
    %c0_i32_0 = arith.constant 0 : i32
    %c0_i32_1 = arith.constant 0 : i32
    return %arg0, %c0_i32, %c0_i32_0 : i32, i32, i32
  }
}

</mosaic_0001>

<bundles_post_ra>
// kernel: tpu_custom_call.1
= control target key start
LH: loop header
LB: loop body
LE: loop exit
PB: predicated region body
PF: predicated region fallthrough
CT: control target
= control target key end

     0   :  { %8 = vsyncpa [#allocation3], 0  ;;  %s950_s0 = inlined_call_operand.hbm [shape: f32[2,4,256], index: 0, kind: input, shape index: {}]   ;;  %s951_s1 = inlined_call_operand.vmem [shape: f32[8,36], index: 1, kind: input, shape index: {}]   ;;  %s952_s2 = inlined_call_operand.vmem [shape: f32[8,1], index: 2, kind: input, shape index: {}]   ;;  %s953_s3 = inlined_call_operand.hbm [shape: f32[2,8,256], index: 3, kind: output, shape index: {}]  }
   0x1   :  { %10 = vsyncpa [#allocation3 + $0x1], 0 }
   0x2   :  { %11 = vsyncpa [#allocation4], 0 }
   0x3   :  { %13 = vsyncpa [#allocation4 + $0x1], 0  ;;  %s758_s12 = smov 0   ;;  %s760_s13 = smov 0  }
   0x4   :  { %s762_s14 = smov 0   ;;  %s764_s15 = smov 0  }
   0x5 LB: > { %s779_s16 = sadd.s32 4294967295, %s727_s15   ;;  %s520_s17 = sadd.s32 4294967294, %s727_s15   ;;  %s727_s15 = sphi %s764_s15, %s971_s15   ;;  %s723_s14 = sphi %s762_s14, %s970_s14   ;;  %s719_s13 = sphi %s760_s13, %s969_s13   ;;  %s715_s12 = sphi %s758_s12, %s968_s12  }
   0x6   : > { %s783_s18 = sadd.s32 1, %s727_s15   ;;  %s26_s19 = sadd.s32 1, %s723_s14 }
   0x7   : > { %s23_s20 = ssub.s32 %s727_s15, %s783_s18  ;;  %p33_p0 = scmp.ne.s32.totalorder %s723_s14, %s719_s13 }
   0x8   : > { %p24_p1 = scmp.eq.s32.totalorder %s23_s20, 0  ;;  %p34_p2 = scmp.eq.s32.totalorder %s727_s15, 0 }
   0x9   : > { %p39_p3 = scmp.ne.s32.totalorder %s719_s13, %s715_s12  ;;  %p40_p4 = scmp.eq.s32.totalorder %s779_s16, 0 }
   0xa   : > { %s795_s21 = scalar_select %p24_p1, %s723_s14, %s26_s19  }
   0xb   : > { %p797_p5 = por %p34_p2, %p33_p0  ;;  %p801_p6 = por %p40_p4, %p39_p3 }
   0xc   : > { %p105_p7 = scmp.eq.s32.totalorder %s779_s16, 1  ;;  %p111_p8 = scmp.eq.s32.totalorder %s520_s17, 1 }
   0xd   : > { %p552_p10 = scmp.lt.s32.totalorder %s727_s15, 2  ;;  %s137_s26 = sand.u32 1, %s723_s14  }
   0xe   : > { %p808_p11 = por %p105_p7, %p33_p0  ;;  %p812_p12 = por %p111_p8, %p39_p3 }
   0xf   : > { %s538_s27 = sshll.u32 %s727_s15, 3  ;;  %s523_s28 = sshll.u32 %s137_s26, 3 }
  0x10   : > { %s146_s4 = scalar_lea.hbm %s950_s0, %s538_s27  ;;  %s141_s6 = scalar_lea.vmem [#allocation2], %s523_s28 }
  0x11   : > { %s148_s5 = sshll.u32 %s146_s4, 4  ;;  %s150_s7 = sshll.u32 %s141_s6, 4  ;;  %s149_s5 = int_to_ptr.hbm [resolvable:$true] %s148_s5  ;;  %s151_s7 = int_to_ptr.vmem [resolvable:$true] %s150_s7 }
  0x12   : > { %p823_p13 = pnand %p552_p10, %p797_p5  ;;  %p526_p0 = scmp.ge.s32.totalorder %s727_s15, 1 }
  0x13   : > { %p155_p1 = scmp.lt.s32.totalorder %s727_s15, 3  ;;  %s138_s9 = scalar_lea.sflag [#allocation3], %s137_s26 }
  0x14   : > { %s631_s10 = sshra.s32 %s149_s5, 4  ;;  %p635_p3 = pneg %p823_p13  ;;  %s632_s10 = int_to_ptr.hbm [resolvable:$true] %s631_s10 }
  0x15   : > { %s633_s11 = scalar_lea.hbm %s632_s10, 8  ;;  %s638_s20 = scalar_lea.hbm %s950_s0, 16 }
  0x16   : > { %p634_p2 = scmp.ne.s32.totalorder %s632_s10, %s633_s11  ;;  %p639_p5 = scmp.lt.s32.totalorder %s632_s10, %s950_s0 }
  0x17   : > { %p640_p8 = scmp.lt.s32.totalorder %s638_s20, %s633_s11 }
  0x18   : > { %p636_p4 = pnand %p635_p3, %p634_p2 }
  0x19   : > { %p641_p10 = por %p640_p8, %p639_p5 }
  0x1a   : > { %p637_p7 = pneg %p636_p4 }
  0x1c   : > { %p642_p9 = pnand %p641_p10, %p637_p7 }
  0x1e   : > { %645 = shalt.err (!%p642_p9)
}
  0x1f   : > { %547 = dma.hbm_to_vmem [thread:$0]  (!%p823_p13), %s149_s5, 128, %s151_s7, %s138_s9  }
  0x20   : > { %p156_p2 = pnand %p526_p0, %p155_p1 }
  0x21   : > { %s844_s26 = sand.u32 (!%p156_p2), 1, %s719_s13  }
  0x22   : > { %159 = sbr.rel (%p156_p2) target bundleno = 372 (0x174), region = 32  ;;  %s527_s28 = sshll.u32 (!%p156_p2), %s844_s26, 3 }
  0x23   : > { %s162_s29 = scalar_lea.sflag (!%p156_p2), [#allocation3], %s844_s26  ;;  %s165_s30 = scalar_lea.vmem (!%p156_p2), [#allocation2], %s527_s28 }
  0x27   : > { %706 = dma.done.wait (%p801_p6), %s162_s29, 128  }
  0x28   : > { %708 = vsyncadd (%p801_p6), %s162_s29, 4294967168  ;;  %v189_v0 = vld [vmem:[%s165_s30] sm:$0xff]  ;;  %s729_s23 = smov 127   ;;  %s730_s4 = smov 1   ;;  %v190_v24 = vlaneseq  ;;  %v373_v27 = vld [vmem:[%s952_s2] sm:$0xff]  ;;  %v737_v29 = vmov 0  }
  0x29   : > { %222 = vst [vmem:[#allocation1] ss:$2 sm:$0xff] %v189_v0  ;;  %s731_s5 = smov 113   ;;  %s732_s6 = smov 112   ;;  %630 = vset.pattern.permute.xlu0 %v737_v29  ;;  %vm290_vm0 = vcmask 1039360   ;;  %vm318_vm1 = vcmask 916480  }
  0x2a   : > { %s733_s7 = smov 17   ;;  %s734_s8 = smov 111   ;;  %v191_v26 = vand.u32 127, %v190_v24  ;;  %vm304_vm2 = vcmask 924672   ;;  %vm329_vm5 = vcmask 908288   ;;  %vm363_vm8 = vcmask 1043456  }
  0x2b   : > { %s735_s9 = smov 16   ;;  %s736_s10 = smov 15   ;;  %vm276_vm9 = vcmask 7168   ;;  %vm229_vm10 = vcmask 138240   ;;  %vm247_vm11 = vcmask 130048   ;;  %vm258_vm12 = vcmask 121856  }
  0x2c   : > { %v192_v28 = vadd.s32 128, %v191_v26  ;;  %v197_v34 = vand.u32 15, %v191_v26  ;;  %vm379_vm13 = vcmask 293888   ;;  %s528_s22 = sshll.u32 %s844_s26, 4  ;;  %s539_s27 = sshll.u32 %s779_s16, 4 }
  0x2d   : > { %s445_s30 = scalar_lea.hbm %s953_s3, %s539_s27  ;;  %s434_s16 = scalar_lea.sflag [#allocation4], %s844_s26 }
  0x2e   : > { %v204_v33 = vand.u32 15, %v192_v28  ;;  %vm862_vm4 = vcmp.lt.s32.totalorder %v197_v34, 15  ;;  %vm873_vm7 = vcmp.ge.s32.totalorder %v197_v34, 1 }
  0x30   : > { %v223_v1 = vld.sshfl [vmem:[#allocation1] sm:$0xff pattern:$0x75316420]  ;;  %v224_v2 = vld.sshfl [vmem:[#allocation1 + $0x8] sm:$0xff pattern:$0x75316420] }
  0x31   : > { %240 = vst [vmem:[#allocation1] ss:$2 sm:$0xff] %v189_v0  ;;  %v625_v18 = vpack.i.bf16 %v224_v2, %v223_v1  ;;  %vm857_vm3 = vcmp.lt.s32.totalorder %v204_v33, 15  ;;  %vm866_vm6 = vcmp.ge.s32.totalorder %v204_v33, 1 }
  0x38   : > { %v241_v3 = vld.sshfl [vmem:[#allocation1] sm:$0xff pattern:$0x75316420]  ;;  %v242_v4 = vld.sshfl [vmem:[#allocation1 + $0x8] sm:$0xff pattern:$0x75316420] }
  0x39   : > { %251 = vst [vmem:[#allocation1] ss:$2 sm:$0xff] %v189_v0  ;;  %v620_v22 = vpack.i.bf16 %v242_v4, %v241_v3 }
  0x40   : > { %v252_v5 = vld.sshfl [vmem:[#allocation1] sm:$0xff pattern:$0x75316420]  ;;  %v253_v6 = vld.sshfl [vmem:[#allocation1 + $0x8] sm:$0xff pattern:$0x75316420] }
  0x41   : > { %269 = vst [vmem:[#allocation1] ss:$2 sm:$0xff] %v189_v0  ;;  %v615_v23 = vpack.i.bf16 %v253_v6, %v252_v5 }
  0x48   : > { %v270_v7 = vld.sshfl [vmem:[#allocation1] sm:$0xff pattern:$0x75316420]  ;;  %v271_v8 = vld.sshfl [vmem:[#allocation1 + $0x8] sm:$0xff pattern:$0x75316420] }
  0x49   : > { %283 = vst [vmem:[#allocation1] ss:$2 sm:$0xff] %v189_v0  ;;  %v595_v12 = vpack.i.bf16 %v271_v8, %v270_v7 }
  0x4b   : > { %596 = vrot.lane.b32.xlu2 %v595_v12, %s730_s4 }
  0x50   : > { %v284_v9 = vld.sshfl [vmem:[#allocation1] sm:$0xff pattern:$0x75316420]  ;;  %v285_v10 = vld.sshfl [vmem:[#allocation1 + $0x8] sm:$0xff pattern:$0x75316420] }
  0x51   : > { %v600_v11 = vpack.i.bf16 %v285_v10, %v284_v9  ;;  %297 = vst [vmem:[#allocation1] ss:$2 sm:$0xff] %v189_v0 }
  0x53   : > { %601 = vrot.lane.b32.xlu1 %v600_v11, %s729_s23  ;;  %s188_s23 = scalar_lea.vmem [#allocation5], %s528_s22 }
  0x54   : > { %s447_s4 = sshll.u32 %s188_s23, 4  ;;  %s448_s4 = int_to_ptr.vmem [resolvable:$true] %s447_s4 }
  0x58   : > { %v298_v13 = vld.sshfl [vmem:[#allocation1] sm:$0xff pattern:$0x75316420]  ;;  %v299_v14 = vld.sshfl [vmem:[#allocation1 + $0x8] sm:$0xff pattern:$0x75316420] }
  0x59   : > { %311 = vst [vmem:[#allocation1] ss:$2 sm:$0xff] %v189_v0  ;;  %v605_v15 = vpack.i.bf16 %v299_v14, %v298_v13 }
  0x5b   : > { %606 = vrot.lane.b32.xlu2 %v605_v15, %s731_s5  ;;  %s449_s5 = sshll.u32 %s445_s30, 4  ;;  %s450_s5 = int_to_ptr.hbm [resolvable:$true] %s449_s5 }
  0x60   : > { %v312_v16 = vld.sshfl [vmem:[#allocation1] sm:$0xff pattern:$0x75316420]  ;;  %v313_v17 = vld.sshfl [vmem:[#allocation1 + $0x8] sm:$0xff pattern:$0x75316420] }
  0x61   : > { %v610_v19 = vpack.i.bf16 %v313_v17, %v312_v16  ;;  %322 = vst [vmem:[#allocation1] ss:$2 sm:$0xff] %v189_v0 }
  0x63   : > { %611 = vrot.lane.b32.xlu0 %v610_v19, %s732_s6  ;;  %626 = vrot.lane.b32.xlu2 %v625_v18, %s733_s7  ;;  %s675_s6 = sshra.s32 %s450_s5, 4  ;;  %s676_s6 = int_to_ptr.hbm [resolvable:$true] %s675_s6 }
  0x64   : > { %s677_s7 = scalar_lea.hbm %s676_s6, 16  ;;  %p682_p0 = scmp.lt.s32.totalorder %s676_s6, %s953_s3 }
  0x65   : > { %p678_p6 = scmp.ne.s32.totalorder %s676_s6, %s677_s7 }
  0x67   : > { %p679_p9 = pnand %p678_p6, %p808_p11 }
  0x68   : > { %v324_v20 = vld.sshfl [vmem:[#allocation1 + $0x8] sm:$0xff pattern:$0x75316420]  ;;  %v323_v21 = vld.sshfl [vmem:[#allocation1] sm:$0xff pattern:$0x75316420] }
  0x69   : > { %327 = vrot.lane.b32.xlu1 %v324_v20, %s734_s8  ;;  %347 = vst [vmem:[#allocation1] ss:$2 sm:$0xff] %v189_v0  ;;  %p680_p13 = pneg %p679_p9 }
  0x6b   : > { %325 = vrot.lane.b32.xlu0 %v323_v21, %s734_s8 }
  0x70   : > { %v349_v2 = vld.sshfl [vmem:[#allocation1 + $0x8] sm:$0xff pattern:$0x75316420]  ;;  %v348_v6 = vld.sshfl [vmem:[#allocation1] sm:$0xff pattern:$0x75316420] }
  0x71   : > { %621 = vrot.lane.b32.xlu1 %v620_v22, %s735_s9 }
  0x73   : > { %616 = vrot.lane.b32.xlu0 %v615_v23, %s736_s10  ;;  %s681_s10 = scalar_lea.hbm %s953_s3, 32 }
  0x74   : > { %p683_p1 = scmp.lt.s32.totalorder %s681_s10, %s677_s7 }
  0x76   : > { %p684_p3 = por %p683_p1, %p682_p0 }
  0x78   : > { %p685_p4 = pnand %p684_p3, %p680_p13 }
  0x7b   : > { %376 = vperm.xlu0 %630, %v373_v27  }
  0xa5   : > { %v852_v25 = vpop.permute.xlu2 %596 }
  0xa6   : > { %v599_v62 = vunpack.i.h.bf16 %v852_v25  ;;  %v598_v63 = vunpack.i.l.bf16 %v852_v25 }
  0xa8   : > { %v280_v11 = vsel %vm276_vm9, 0.0, %v598_v63  ;;  %v277_v12 = vsel %vm276_vm9, %v598_v63, %v599_v62 }
  0xa9   : > { %v281_v19 = vsel %vm873_vm7, %v280_v11, 0.0  ;;  %v282_v21 = vsel %vm866_vm6, %v277_v12, 0.0 }
  0xaa   : > { %v344_v33 = vrot.slane %v282_v21, 4 }
  0xb5   : > { %v607_v31 = vpop.permute.xlu2 %606 }
  0xb6   : > { %v609_v37 = vunpack.i.h.bf16 %v607_v31  ;;  %v608_v41 = vunpack.i.l.bf16 %v607_v31  ;;  %v343_v31 = vrot.slane %v281_v19, 4 }
  0xb8   : > { %v308_v47 = vsel %vm304_vm2, %v609_v37, 0.0  ;;  %v305_v53 = vsel %vm304_vm2, %v608_v41, %v609_v37 }
  0xb9   : > { %v310_v56 = vsel %vm866_vm6, %v308_v47, 0.0  ;;  %v309_v1 = vsel %vm873_vm7, %v305_v53, 0.0 }
  0xbd   : > { %v627_v61 = vpop.permute.xlu2 %626 }
  0xbe   : > { %v629_v7 = vunpack.i.h.bf16 %v627_v61  ;;  %v628_v8 = vunpack.i.l.bf16 %v627_v61 }
  0xc0   : > { %v233_v17 = vsel %vm229_vm10, 0.0, %v628_v8  ;;  %v230_v18 = vsel %vm229_vm10, %v628_v8, %v629_v7 }
  0xc1   : > { %v238_v27 = vsel %vm873_vm7, %v233_v17, 0.0  ;;  %v239_v28 = vsel %vm866_vm6, %v230_v18, 0.0 }
  0xc5   : > { %v602_v30 = vpop.permute.xlu1 %601 }
  0xc6   : > { %v604_v32 = vunpack.i.h.bf16 %v602_v30  ;;  %v603_v35 = vunpack.i.l.bf16 %v602_v30 }
  0xc8   : > { %v294_v40 = vsel %vm290_vm0, %v604_v32, 0.0  ;;  %v291_v45 = vsel %vm290_vm0, %v603_v35, %v604_v32 }
  0xc9   : > { %v296_v48 = vsel %vm857_vm3, %v294_v40, 0.0  ;;  %v295_v55 = vsel %vm862_vm4, %v291_v45, 0.0  ;;  %v372_v40 = vld [vmem:[%s951_s1] sm:$0xff] }
  0xca   : > { %v355_v60 = vrot.slane %v296_v48, 4  ;;  %v354_v5 = vrot.slane %v295_v55, 4 }
  0xcc   : > { %v369_v10 = vsel %vm363_vm8, %v349_v2, %v355_v60  ;;  %v368_v13 = vsel %vm363_vm8, %v348_v6, %v354_v5 }
  0xd5   : > { %v612_v36 = vpop.permute.xlu0 %611 }
  0xd6   : > { %v614_v38 = vunpack.i.h.bf16 %v612_v36  ;;  %v613_v39 = vunpack.i.l.bf16 %v612_v36 }
  0xd8   : > { %v321_v43 = vsel %vm318_vm1, %v614_v38, 0.0  ;;  %v319_v49 = vsel %vm318_vm1, %v613_v39, %v614_v38 }
  0xd9   : > { %v360_v51 = vrot.slane %v321_v43, 4  ;;  %v359_v59 = vrot.slane %v319_v49, 4 }
  0xdb   : > { %v328_v52 = vpop.permute.xlu1 %327  ;;  %v371_v4 = vsel %vm363_vm8, %v310_v56, %v360_v51  ;;  %v370_v9 = vsel %vm363_vm8, %v309_v1, %v359_v59 }
  0xdc   : > { %v333_v54 = vsel %vm329_vm5, %v328_v52, 0.0 }
  0xdd   : > { %v326_v57 = vpop.permute.xlu0 %325  ;;  %v335_v58 = vsel %vm857_vm3, %v333_v54, 0.0 }
  0xde   : > { %531 = vmatpush.msk.msra.mxu1 %vm363_vm8, %v335_v58  ;;  %v330_v0 = vsel %vm329_vm5, %v326_v57, %v328_v52 }
  0xdf   : > { %v334_v3 = vsel %vm862_vm4, %v330_v0, 0.0 }
  0xe0   : > { %529 = vmatpush.msk.msra.mxu0 %vm363_vm8, %v334_v3  ;;  %421 = vmatpush.msra.mxu1 %v371_v4 }
  0xe2   : > { %401 = vmatpush.msra.mxu0 %v370_v9  ;;  %422 = vmatpush.msra.mxu1 %v369_v10 }
  0xe3   : > { %v622_v14 = vpop.permute.xlu1 %621 }
  0xe4   : > { %402 = vmatpush.msra.mxu0 %v368_v13  ;;  %v624_v15 = vunpack.i.h.bf16 %v622_v14  ;;  %v623_v16 = vunpack.i.l.bf16 %v622_v14 }
  0xe5   : > { %v617_v20 = vpop.permute.xlu0 %616 }
  0xe6   : > { %v619_v22 = vunpack.i.h.bf16 %v617_v20  ;;  %v618_v23 = vunpack.i.l.bf16 %v617_v20  ;;  %v248_v24 = vsel %vm247_vm11, %v623_v16, %v624_v15  ;;  %v250_v25 = vsel %vm247_vm11, 0.0, %v623_v16 }
  0xe7   : > { %v337_v26 = vrot.slane %v250_v25, 4  ;;  %v338_v29 = vrot.slane %v248_v24, 4 }
  0xe8   : > { %v262_v30 = vsel %vm258_vm12, 0.0, %v618_v23  ;;  %v259_v32 = vsel %vm258_vm12, %v618_v23, %v619_v22 }
  0xe9   : > { %v267_v34 = vsel %vm862_vm4, %v262_v30, 0.0  ;;  %v268_v35 = vsel %vm857_vm3, %v259_v32, 0.0  ;;  %v364_v38 = vsel %vm363_vm8, %v238_v27, %v337_v26  ;;  %v365_v39 = vsel %vm363_vm8, %v239_v28, %v338_v29 }
  0xea   : > { %v366_v36 = vsel %vm363_vm8, %v267_v34, %v343_v31  ;;  %v367_v37 = vsel %vm363_vm8, %v268_v35, %v344_v33 }
  0xeb   : > { %403 = vmatpush.msra.mxu0 %v366_v36  ;;  %423 = vmatpush.msra.mxu1 %v367_v37 }
  0xed   : > { %404 = vmatpush.msra.mxu0 %v364_v38  ;;  %424 = vmatpush.msra.mxu1 %v365_v39  ;;  %v377_v41 = vpop.permute.xlu0 %376 }
  0xee   : > { %530 = vmatmul.msk.f32.vlgmr.msra.gmra.mxu0 %vm379_vm13, %v372_v40  ;;  %532 = vmatmul.msk.f32.vlgmr.msra.gmra.mxu1 %vm379_vm13, %v372_v40 }
 0x16b   : > { %v406_v42 = vpop.f32.mrf.mxu0  ;;  %v426_v43 = vpop.f32.mrf.mxu1 }
 0x16c   : > { %v407_v44 = vadd.f32 %v406_v42, %v377_v41  ;;  %v427_v45 = vadd.f32 %v426_v43, %v377_v41 }
 0x16e   : > { %v429_v46 = vmax.f32 %v407_v44, 0.0  ;;  %v430_v47 = vmax.f32 %v427_v45, 0.0 }
 0x170   : > { %431 = vst [vmem:[%s188_s23] sm:$0xff] %v429_v46 }
 0x171   : > { %432 = vst [vmem:[%s188_s23 + $0x8] sm:$0xff] %v430_v47 }
 0x172   : > { %688 = shalt.err (!%p685_p4)
}
 0x173   : > { %542 = dma.vmem_to_hbm [thread:$0]  (%p808_p11), %s448_s4, 256, %s450_s5, %s434_s16  }
 0x174 PF: > { %s461_s26 = sand.u32 1, %s715_s12   ;;  %p967_p7 = scmp.ge.s32.totalorder %s727_s15, 2 }
 0x175   : > { %s462_s19 = scalar_lea.sflag [#allocation4], %s461_s26 }
 0x176   : > { %p549_p5 = pnand %p967_p7, %p812_p12 }
 0x178   : > { %p550_p8 = pneg %p549_p5 }
 0x17a   : > { %710 = dma.done.wait (%p550_p8), %s462_s19, 256  }
 0x17b   : > { %712 = vsyncadd (%p550_p8), %s462_s19, 4294967040  ;;  %p16_p10 = scmp.ge.s32.totalorder %s783_s18, 4   ;;  %s968_s12 = smov %s719_s13 }
 0x17c   : > { %s969_s13 = smov %s723_s14  ;;  %s970_s14 = smov %s795_s21 }
 0x17d   : > { %s971_s15 = smov %s783_s18  ;;  %18 = sbr.rel (!%p16_p10) target bundleno = 5 (0x5), region = 77 }
 0x182   :  { %468 = vsyncpa [#allocation3], 1 }
 0x183   :  { %470 = vsyncpa [#allocation3 + $0x1], 1 }
 0x184   :  { %471 = vsyncpa [#allocation4], 1 }
 0x185   :  { %473 = vsyncpa [#allocation4 + $0x1], 1 }

</bundles_post_ra>
